<compile_context>
chip_gen: v7x
topology: tpu7x:2x2x1
jax: 0.10.0
libtpu: 0.0.40
codegen_flags: <defaults>
</compile_context>

<pallas_src>
import functools
import math

import jax
import jax.numpy as jnp
from jax.experimental import pallas as pl
from jax.experimental.pallas import tpu as pltpu

_MIN_SPLIT_ROWS = 512          # only split a single tile across TCs above this
_DEFAULT_SCOPED_VMEM = 32 * 1024 * 1024
_VMEM_CAP = 48 * 1024 * 1024


def _round_up(x, m):
    return (x + m - 1) // m * m


def _cdiv(a, b):
    return -(-a // b)


def _apply_activation(h, activation):
    if activation == "relu":
        return jnp.maximum(h, 0.0)
    if activation == "tanh":
        return jnp.tanh(h)
    if activation == "logistic":
        return jax.nn.sigmoid(h)
    if activation == "none":
        return h
    raise ValueError(f"unknown activation {activation}")


def _fused_mlp_kernel(x_ref, *refs, num_layers, activation):
    """h = x; for each layer: h = act(h @ W + b); final layer has no act.

    refs = (w0, b0, w1, b1, ..., w_{L-1}, b_{L-1}, out_ref).
    Intermediates never leave VMEM/registers; only the final tile is stored.
    Activations are kept f32 on the VPU; they are cast to the weight dtype
    only at the MXU dot (f32 accumulation via preferred_element_type).
    """
    o_ref = refs[-1]
    h = x_ref[...].astype(jnp.float32)
    for l in range(num_layers):
        w = refs[2 * l][...]
        b = refs[2 * l + 1][...].astype(jnp.float32)   # (1, out) broadcast over batch
        h = jnp.dot(h.astype(w.dtype), w, preferred_element_type=jnp.float32) + b
        if l < num_layers - 1:
            h = _apply_activation(h, activation)
    o_ref[...] = h.astype(o_ref.dtype)


def mlp_forward(x, params, activation, *, block_b=2048):
    """Run the whole MLP in a single pallas_call, tiled over the batch axis."""
    B, d_in = x.shape
    num_layers = len(params)
    out_dim = params[-1][0].shape[1]

    # --- choose batch tiling ------------------------------------------------
    b_al = _round_up(B, 8)
    num_tiles = max(1, _cdiv(b_al, block_b))
    # v7x megacore: if everything fits in one tile but the batch is large,
    # split into two tiles so ("parallel",) gives both TensorCores work.
    if num_tiles == 1 and b_al >= 2 * _MIN_SPLIT_ROWS:
        num_tiles = 2
    tb = _round_up(_cdiv(b_al, num_tiles), 8)
    b_pad = _round_up(B, tb)
    x_p = x if b_pad == B else jnp.pad(x, ((0, b_pad - B), (0, 0)))
    grid = (b_pad // tb,)

    flat_wb = []
    wb_shapes = []
    for w, b in params:
        flat_wb += [w, b]
        wb_shapes += [w.shape, b.shape]

    # --- cost / VMEM estimates ----------------------------------------------
    flops = 2 * b_pad * sum(w.shape[0] * w.shape[1] for w, _ in params)
    transcendentals = 0
    if activation in ("tanh", "logistic"):
        transcendentals = b_pad * sum(w.shape[1] for w, _ in params[:-1])
    wb_bytes = sum(int(a.size) * a.dtype.itemsize for a in flat_wb)
    bytes_accessed = (b_pad * d_in * x.dtype.itemsize
                      + wb_bytes
                      + b_pad * out_dim * 4)

    max_width = max([d_in] + [w.shape[1] for w, _ in params])
    vmem_needed = (
        2 * tb * d_in * x.dtype.itemsize      # x tile, double-buffered
        + 2 * tb * out_dim * 4                # out tile, double-buffered
        + 2 * wb_bytes                        # weights/biases (worst case 2x)
        + 2 * tb * max_width * 4              # live f32 activations
    )
    vmem_needed = 2 * vmem_needed             # headroom for compiler scratch
    vmem_limit = None
    if vmem_needed > _DEFAULT_SCOPED_VMEM:
        vmem_limit = min(_round_up(vmem_needed, 1024), _VMEM_CAP)

    kernel = functools.partial(
        _fused_mlp_kernel, num_layers=num_layers, activation=activation)

    def run(single_buffer_weights):
        in_specs = [pl.BlockSpec((tb, d_in), lambda i: (i, 0))]
        for shp in wb_shapes:
            if single_buffer_weights:
                # Constant index_map -> block never changes across grid steps;
                # single-buffer to halve its resident VMEM.
                spec = pl.BlockSpec(shp, lambda i: (0, 0),
                                    pipeline_mode=pl.Buffered(buffer_count=1))
            else:
                spec = pl.BlockSpec(shp, lambda i: (0, 0))
            in_specs.append(spec)

        return pl.pallas_call(
            kernel,
            out_shape=jax.ShapeDtypeStruct((b_pad, out_dim), jnp.float32),
            grid=grid,
            in_specs=in_specs,
            out_specs=pl.BlockSpec((tb, out_dim), lambda i: (i, 0)),
            compiler_params=pltpu.CompilerParams(
                dimension_semantics=("parallel",),   # batch tiles -> both TCs
                vmem_limit_bytes=vmem_limit,
            ),
            cost_estimate=pl.CostEstimate(
                flops=flops,
                transcendentals=transcendentals,
                bytes_accessed=bytes_accessed,
            ),
        )(x_p, *flat_wb)

    try:
        out = jax.block_until_ready(run(single_buffer_weights=True))
    except Exception:
        # pl.Buffered(1) not supported for the top-level grid pipeline on this
        # jax version -> fall back to default (double) buffering; identical
        # semantics, costs only ~2x the (tiny) weight VMEM.
        out = run(single_buffer_weights=False)

    return out[:B, :] if b_pad != B else out


def prepare_params(params, weight_dtype=jnp.float32):
    """One-time (hoisted) preprocessing of the parameter pytree.

    Use weight_dtype=jnp.bfloat16 on v6e/v7x to halve weight DMA/VMEM and run
    the matmuls at the MXU's native bf16 rate; biases and accumulation stay
    f32 (and activations stay f32 on the VPU, which also keeps v5e happy).
    """
    return [(w.astype(weight_dtype), b.astype(jnp.float32)) for w, b in params]


def init_mlp_params(key, input_dim, layers):
    """PyTorch nn.Linear default init: U(-1/sqrt(fan_in), 1/sqrt(fan_in))."""
    params = []
    prev = input_dim
    dims = list(layers) + [1]            # final Linear(prev, 1)
    for out_dim in dims:
        key, kw, kb = jax.random.split(key, 3)
        bound = 1.0 / math.sqrt(prev)
        # store weight as (in, out) so the kernel does x @ W (no transpose)
        w = jax.random.uniform(kw, (prev, out_dim), jnp.float32, -bound, bound)
        b = jax.random.uniform(kb, (1, out_dim), jnp.float32, -bound, bound)
        params.append((w, b))
        prev = out_dim
    return params


if __name__ == "__main__":
    B, INPUT_DIM = 8, 32
    LAYERS = [64, 32]
    ACTIVATION = "relu"

    key = jax.random.PRNGKey(0)
    kx, kp = jax.random.split(key)
    x = jax.random.normal(kx, (B, INPUT_DIM), jnp.float32)
    params = init_mlp_params(kp, INPUT_DIM, LAYERS)

    # plain-JAX reference
    ref = x
    for w, b in params[:-1]:
        ref = jnp.maximum(ref @ w + b, 0.0)
    ref = ref @ params[-1][0] + params[-1][1]

    # f32 weights (exact path)
    out = mlp_forward(x, prepare_params(params), ACTIVATION)
    out = jax.block_until_ready(out)
    assert out.shape == (B, 1), out.shape
    assert jnp.allclose(out, ref, atol=1e-5, rtol=1e-5)

    # bf16 weights (MXU-native on v6e/v7x); f32 activations & accumulation
    out_bf16 = mlp_forward(x, prepare_params(params, jnp.bfloat16), ACTIVATION)
    out_bf16 = jax.block_until_ready(out_bf16)
    assert out_bf16.shape == (B, 1), out_bf16.shape
    assert jnp.allclose(out_bf16, ref, atol=1e-1, rtol=1e-1)

    print("KERNEL_OK")
</pallas_src>

<mosaic_0001>
module attributes {stable_mosaic.version = 11 : i64} {
  func.func @_fused_mlp_kernel(%arg0: i32, %arg1: memref<8x32xf32, #tpu.memory_space<vmem>>, %arg2: memref<32x64xf32, #tpu.memory_space<vmem>>, %arg3: memref<1x64xf32, #tpu.memory_space<vmem>>, %arg4: memref<64x32xf32, #tpu.memory_space<vmem>>, %arg5: memref<1x32xf32, #tpu.memory_space<vmem>>, %arg6: memref<32x1xf32, #tpu.memory_space<vmem>>, %arg7: memref<1x1xf32, #tpu.memory_space<vmem>>, %arg8: memref<8x1xf32, #tpu.memory_space<vmem>>) attributes {dimension_semantics = [#tpu.dimension_semantics<parallel>], iteration_bounds = array<i64: 1>, scalar_prefetch = 0 : i64, scratch_operands = 0 : i64, tpu.core_type = #tpu.core_type<tc>, window_params = [{transform_indices = @transform_0, window_bounds = array<i64: 8, 32>}, {pipeline_mode = #tpu.pipeline_mode<synchronous>, transform_indices = @transform_1, window_bounds = array<i64: 32, 64>}, {pipeline_mode = #tpu.pipeline_mode<synchronous>, transform_indices = @transform_2, window_bounds = array<i64: 1, 64>}, {pipeline_mode = #tpu.pipeline_mode<synchronous>, transform_indices = @transform_3, window_bounds = array<i64: 64, 32>}, {pipeline_mode = #tpu.pipeline_mode<synchronous>, transform_indices = @transform_4, window_bounds = array<i64: 1, 32>}, {pipeline_mode = #tpu.pipeline_mode<synchronous>, transform_indices = @transform_5, window_bounds = array<i64: 32, 1>}, {pipeline_mode = #tpu.pipeline_mode<synchronous>, transform_indices = @transform_6, window_bounds = array<i64: 1, 1>}, {transform_indices = @transform_7, window_bounds = array<i64: 8, 1>}]} {
    %c0 = arith.constant 0 : index
    %c0_0 = arith.constant 0 : index
    %0 = vector.load %arg1[%c0, %c0_0] : memref<8x32xf32, #tpu.memory_space<vmem>>, vector<8x32xf32>
    %c0_1 = arith.constant 0 : index
    %c0_2 = arith.constant 0 : index
    %1 = vector.load %arg2[%c0_1, %c0_2] : memref<32x64xf32, #tpu.memory_space<vmem>>, vector<32x64xf32>
    %c0_3 = arith.constant 0 : index
    %c0_4 = arith.constant 0 : index
    %2 = vector.load %arg3[%c0_3, %c0_4] : memref<1x64xf32, #tpu.memory_space<vmem>>, vector<1x64xf32>
    %cst = arith.constant dense<0.000000e+00> : vector<8x64xf32>
    %3 = tpu.matmul %0, %1, %cst {dimension_numbers = #tpu.dot_dimension_numbers<[1], [0], [0], [1], [0, 0, 1, 1], [], []>} : vector<8x32xf32>, vector<32x64xf32>, vector<8x64xf32> -> vector<8x64xf32>
    %4 = vector.broadcast %2 : vector<1x64xf32> to vector<8x64xf32>
    %5 = arith.addf %3, %4 : vector<8x64xf32>
    %cst_5 = arith.constant 0.000000e+00 : f32
    %6 = vector.broadcast %cst_5 : f32 to vector<8x64xf32>
    %7 = arith.maximumf %5, %6 : vector<8x64xf32>
    %c0_6 = arith.constant 0 : index
    %c0_7 = arith.constant 0 : index
    %8 = vector.load %arg4[%c0_6, %c0_7] : memref<64x32xf32, #tpu.memory_space<vmem>>, vector<64x32xf32>
    %c0_8 = arith.constant 0 : index
    %c0_9 = arith.constant 0 : index
    %9 = vector.load %arg5[%c0_8, %c0_9] : memref<1x32xf32, #tpu.memory_space<vmem>>, vector<1x32xf32>
    %cst_10 = arith.constant dense<0.000000e+00> : vector<8x32xf32>
    %10 = tpu.matmul %7, %8, %cst_10 {dimension_numbers = #tpu.dot_dimension_numbers<[1], [0], [0], [1], [0, 0, 1, 1], [], []>} : vector<8x64xf32>, vector<64x32xf32>, vector<8x32xf32> -> vector<8x32xf32>
    %11 = vector.broadcast %9 : vector<1x32xf32> to vector<8x32xf32>
    %12 = arith.addf %10, %11 : vector<8x32xf32>
    %cst_11 = arith.constant 0.000000e+00 : f32
    %13 = vector.broadcast %cst_11 : f32 to vector<8x32xf32>
    %14 = arith.maximumf %12, %13 : vector<8x32xf32>
    %c0_12 = arith.constant 0 : index
    %c0_13 = arith.constant 0 : index
    %15 = vector.load %arg6[%c0_12, %c0_13] : memref<32x1xf32, #tpu.memory_space<vmem>>, vector<32x1xf32>
    %c0_14 = arith.constant 0 : index
    %c0_15 = arith.constant 0 : index
    %16 = vector.load %arg7[%c0_14, %c0_15] : memref<1x1xf32, #tpu.memory_space<vmem>>, vector<1x1xf32>
    %cst_16 = arith.constant dense<0.000000e+00> : vector<8x1xf32>
    %17 = tpu.matmul %14, %15, %cst_16 {dimension_numbers = #tpu.dot_dimension_numbers<[1], [0], [0], [1], [0, 0, 1, 1], [], []>} : vector<8x32xf32>, vector<32x1xf32>, vector<8x1xf32> -> vector<8x1xf32>
    %18 = vector.broadcast %16 : vector<1x1xf32> to vector<8x1xf32>
    %19 = arith.addf %17, %18 : vector<8x1xf32>
    %c0_17 = arith.constant 0 : index
    %c0_18 = arith.constant 0 : index
    %20 = vector.load %arg8[%c0_17, %c0_18] : memref<8x1xf32, #tpu.memory_space<vmem>>, vector<8x1xf32>
    tpu.vector_store %arg8[%c0_17, %c0_18], %19 {strides = array<i32>} : memref<8x1xf32, #tpu.memory_space<vmem>>, vector<8x1xf32>,
    return
  }
  func.func @transform_0(%arg0: i32) -> (i32, i32) {
    %c0_i32 = arith.constant 0 : i32
    %c0_i32_0 = arith.constant 0 : i32
    return %arg0, %c0_i32 : i32, i32
  }
  func.func @transform_1(%arg0: i32) -> (i32, i32) {
    %c0_i32 = arith.constant 0 : i32
    %c0_i32_0 = arith.constant 0 : i32
    %c0_i32_1 = arith.constant 0 : i32
    return %c0_i32, %c0_i32_0 : i32, i32
  }
  func.func @transform_2(%arg0: i32) -> (i32, i32) {
    %c0_i32 = arith.constant 0 : i32
    %c0_i32_0 = arith.constant 0 : i32
    %c0_i32_1 = arith.constant 0 : i32
    return %c0_i32, %c0_i32_0 : i32, i32
  }
  func.func @transform_3(%arg0: i32) -> (i32, i32) {
    %c0_i32 = arith.constant 0 : i32
    %c0_i32_0 = arith.constant 0 : i32
    %c0_i32_1 = arith.constant 0 : i32
    return %c0_i32, %c0_i32_0 : i32, i32
  }
  func.func @transform_4(%arg0: i32) -> (i32, i32) {
    %c0_i32 = arith.constant 0 : i32
    %c0_i32_0 = arith.constant 0 : i32
    %c0_i32_1 = arith.constant 0 : i32
    return %c0_i32, %c0_i32_0 : i32, i32
  }
  func.func @transform_5(%arg0: i32) -> (i32, i32) {
    %c0_i32 = arith.constant 0 : i32
    %c0_i32_0 = arith.constant 0 : i32
    %c0_i32_1 = arith.constant 0 : i32
    return %c0_i32, %c0_i32_0 : i32, i32
  }
  func.func @transform_6(%arg0: i32) -> (i32, i32) {
    %c0_i32 = arith.constant 0 : i32
    %c0_i32_0 = arith.constant 0 : i32
    %c0_i32_1 = arith.constant 0 : i32
    return %c0_i32, %c0_i32_0 : i32, i32
  }
  func.func @transform_7(%arg0: i32) -> (i32, i32) {
    %c0_i32 = arith.constant 0 : i32
    %c0_i32_0 = arith.constant 0 : i32
    return %arg0, %c0_i32 : i32, i32
  }
}

module attributes {stable_mosaic.version = 11 : i64} {
  func.func @_fused_mlp_kernel(%arg0: i32, %arg1: memref<8x32xf32, #tpu.memory_space<vmem>>, %arg2: memref<32x64xf32, #tpu.memory_space<vmem>>, %arg3: memref<1x64xf32, #tpu.memory_space<vmem>>, %arg4: memref<64x32xf32, #tpu.memory_space<vmem>>, %arg5: memref<1x32xf32, #tpu.memory_space<vmem>>, %arg6: memref<32x1xf32, #tpu.memory_space<vmem>>, %arg7: memref<1x1xf32, #tpu.memory_space<vmem>>, %arg8: memref<8x1xf32, #tpu.memory_space<vmem>>) attributes {dimension_semantics = [#tpu.dimension_semantics<parallel>], iteration_bounds = array<i64: 1>, scalar_prefetch = 0 : i64, scratch_operands = 0 : i64, tpu.core_type = #tpu.core_type<tc>, window_params = [{transform_indices = @transform_0, window_bounds = array<i64: 8, 32>}, {pipeline_mode = #tpu.pipeline_mode<synchronous>, transform_indices = @transform_1, window_bounds = array<i64: 32, 64>}, {pipeline_mode = #tpu.pipeline_mode<synchronous>, transform_indices = @transform_2, window_bounds = array<i64: 1, 64>}, {pipeline_mode = #tpu.pipeline_mode<synchronous>, transform_indices = @transform_3, window_bounds = array<i64: 64, 32>}, {pipeline_mode = #tpu.pipeline_mode<synchronous>, transform_indices = @transform_4, window_bounds = array<i64: 1, 32>}, {pipeline_mode = #tpu.pipeline_mode<synchronous>, transform_indices = @transform_5, window_bounds = array<i64: 32, 1>}, {pipeline_mode = #tpu.pipeline_mode<synchronous>, transform_indices = @transform_6, window_bounds = array<i64: 1, 1>}, {transform_indices = @transform_7, window_bounds = array<i64: 8, 1>}]} {
    %c0 = arith.constant 0 : index
    %c0_0 = arith.constant 0 : index
    %0 = vector.load %arg1[%c0, %c0_0] : memref<8x32xf32, #tpu.memory_space<vmem>>, vector<8x32xf32>
    %c0_1 = arith.constant 0 : index
    %c0_2 = arith.constant 0 : index
    %1 = vector.load %arg2[%c0_1, %c0_2] : memref<32x64xf32, #tpu.memory_space<vmem>>, vector<32x64xf32>
    %c0_3 = arith.constant 0 : index
    %c0_4 = arith.constant 0 : index
    %2 = vector.load %arg3[%c0_3, %c0_4] : memref<1x64xf32, #tpu.memory_space<vmem>>, vector<1x64xf32>
    %cst = arith.constant dense<0.000000e+00> : vector<8x64xf32>
    %3 = tpu.matmul %0, %1, %cst {dimension_numbers = #tpu.dot_dimension_numbers<[1], [0], [0], [1], [0, 0, 1, 1], [], []>} : vector<8x32xf32>, vector<32x64xf32>, vector<8x64xf32> -> vector<8x64xf32>
    %4 = vector.broadcast %2 : vector<1x64xf32> to vector<8x64xf32>
    %5 = arith.addf %3, %4 : vector<8x64xf32>
    %cst_5 = arith.constant 0.000000e+00 : f32
    %6 = vector.broadcast %cst_5 : f32 to vector<8x64xf32>
    %7 = arith.maximumf %5, %6 : vector<8x64xf32>
    %c0_6 = arith.constant 0 : index
    %c0_7 = arith.constant 0 : index
    %8 = vector.load %arg4[%c0_6, %c0_7] : memref<64x32xf32, #tpu.memory_space<vmem>>, vector<64x32xf32>
    %c0_8 = arith.constant 0 : index
    %c0_9 = arith.constant 0 : index
    %9 = vector.load %arg5[%c0_8, %c0_9] : memref<1x32xf32, #tpu.memory_space<vmem>>, vector<1x32xf32>
    %cst_10 = arith.constant dense<0.000000e+00> : vector<8x32xf32>
    %10 = tpu.matmul %7, %8, %cst_10 {dimension_numbers = #tpu.dot_dimension_numbers<[1], [0], [0], [1], [0, 0, 1, 1], [], []>} : vector<8x64xf32>, vector<64x32xf32>, vector<8x32xf32> -> vector<8x32xf32>
    %11 = vector.broadcast %9 : vector<1x32xf32> to vector<8x32xf32>
    %12 = arith.addf %10, %11 : vector<8x32xf32>
    %cst_11 = arith.constant 0.000000e+00 : f32
    %13 = vector.broadcast %cst_11 : f32 to vector<8x32xf32>
    %14 = arith.maximumf %12, %13 : vector<8x32xf32>
    %c0_12 = arith.constant 0 : index
    %c0_13 = arith.constant 0 : index
    %15 = vector.load %arg6[%c0_12, %c0_13] : memref<32x1xf32, #tpu.memory_space<vmem>>, vector<32x1xf32>
    %c0_14 = arith.constant 0 : index
    %c0_15 = arith.constant 0 : index
    %16 = vector.load %arg7[%c0_14, %c0_15] : memref<1x1xf32, #tpu.memory_space<vmem>>, vector<1x1xf32>
    %cst_16 = arith.constant dense<0.000000e+00> : vector<8x1xf32>
    %17 = tpu.matmul %14, %15, %cst_16 {dimension_numbers = #tpu.dot_dimension_numbers<[1], [0], [0], [1], [0, 0, 1, 1], [], []>} : vector<8x32xf32>, vector<32x1xf32>, vector<8x1xf32> -> vector<8x1xf32>
    %18 = vector.broadcast %16 : vector<1x1xf32> to vector<8x1xf32>
    %19 = arith.addf %17, %18 : vector<8x1xf32>
    %c0_17 = arith.constant 0 : index
    %c0_18 = arith.constant 0 : index
    %20 = vector.load %arg8[%c0_17, %c0_18] : memref<8x1xf32, #tpu.memory_space<vmem>>, vector<8x1xf32>
    tpu.vector_store %arg8[%c0_17, %c0_18], %19 {strides = array<i32>} : memref<8x1xf32, #tpu.memory_space<vmem>>, vector<8x1xf32>,
    return
  }
  func.func @transform_0(%arg0: i32) -> (i32, i32) {
    %c0_i32 = arith.constant 0 : i32
    %c0_i32_0 = arith.constant 0 : i32
    return %arg0, %c0_i32 : i32, i32
  }
  func.func @transform_1(%arg0: i32) -> (i32, i32) {
    %c0_i32 = arith.constant 0 : i32
    %c0_i32_0 = arith.constant 0 : i32
    %c0_i32_1 = arith.constant 0 : i32
    return %c0_i32, %c0_i32_0 : i32, i32
  }
  func.func @transform_2(%arg0: i32) -> (i32, i32) {
    %c0_i32 = arith.constant 0 : i32
    %c0_i32_0 = arith.constant 0 : i32
    %c0_i32_1 = arith.constant 0 : i32
    return %c0_i32, %c0_i32_0 : i32, i32
  }
  func.func @transform_3(%arg0: i32) -> (i32, i32) {
    %c0_i32 = arith.constant 0 : i32
    %c0_i32_0 = arith.constant 0 : i32
    %c0_i32_1 = arith.constant 0 : i32
    return %c0_i32, %c0_i32_0 : i32, i32
  }
  func.func @transform_4(%arg0: i32) -> (i32, i32) {
    %c0_i32 = arith.constant 0 : i32
    %c0_i32_0 = arith.constant 0 : i32
    %c0_i32_1 = arith.constant 0 : i32
    return %c0_i32, %c0_i32_0 : i32, i32
  }
  func.func @transform_5(%arg0: i32) -> (i32, i32) {
    %c0_i32 = arith.constant 0 : i32
    %c0_i32_0 = arith.constant 0 : i32
    %c0_i32_1 = arith.constant 0 : i32
    return %c0_i32, %c0_i32_0 : i32, i32
  }
  func.func @transform_6(%arg0: i32) -> (i32, i32) {
    %c0_i32 = arith.constant 0 : i32
    %c0_i32_0 = arith.constant 0 : i32
    %c0_i32_1 = arith.constant 0 : i32
    return %c0_i32, %c0_i32_0 : i32, i32
  }
  func.func @transform_7(%arg0: i32) -> (i32, i32) {
    %c0_i32 = arith.constant 0 : i32
    %c0_i32_0 = arith.constant 0 : i32
    return %arg0, %c0_i32 : i32, i32
  }
}

</mosaic_0001>

<bundles_post_ra>
// kernel: tpu_custom_call.1
= control target key start
LH: loop header
LB: loop body
LE: loop exit
PB: predicated region body
PF: predicated region fallthrough
CT: control target
= control target key end

     0   :  { %v388_v0 = vmov 0.0|0.0   ;;  %vm389_vm0 = vmmov 0   ;;  %v390_v4 = vmov 0.0   ;;  %vm40_vm1 = vcmask 261120   ;;  %s499_s1 = inlined_call_operand.vmem [shape: f32[32,64], index: 1, kind: input, shape index: {}]   ;;  %s500_s3 = inlined_call_operand.vmem [shape: f32[64,32], index: 3, kind: input, shape index: {}]   ;;  %s501_s0 = inlined_call_operand.vmem [shape: f32[8,32], index: 0, kind: input, shape index: {}]   ;;  %s502_s5 = inlined_call_operand.vmem [shape: f32[32,1], index: 5, kind: input, shape index: {}]   ;;  %s503_s2 = inlined_call_operand.vmem [shape: f32[1,64], index: 2, kind: input, shape index: {}]   ;;  %s504_s6 = inlined_call_operand.<no memory space> [shape: f32[1,1], index: 6, kind: input, shape index: {}]   ;;  %s505_s4 = inlined_call_operand.vmem [shape: f32[1,32], index: 4, kind: input, shape index: {}]   ;;  %s506_s7 = inlined_call_operand.vmem [shape: f32[8,1], index: 7, kind: output, shape index: {}]  }
   0x1   :  { %361 = vmatprep.subr.bf16.mxu0 %v388_v0  ;;  %v29_v1 = vld [vmem:[%s499_s1] sm:$0xff]  ;;  %v30_v2 = vld [vmem:[%s499_s1 + $0x8] sm:$0xff]  ;;  %v31_v3 = vld [vmem:[%s499_s1 + $0x10] sm:$0xff]  ;;  %328 = vmatprep.mubr.msk.f32.mxu0 %vm389_vm0, %v390_v4  ;;  %vm130_vm2 = vcmask 523264   ;;  %v12_v32 = vstv %s504_s6  ;;  %vm289_vm3 = vcmask 7168  }
   0x2   :  { %v362_v5 = vpack.c.bf16 %v30_v2, %v29_v1  ;;  %v32_v6 = vld [vmem:[%s499_s1 + $0x18] sm:$0xff]  ;;  %367 = vmatprep.subr.bf16.mxu1 %v388_v0  ;;  %v115_v7 = vld [vmem:[%s500_s3] sm:$0xff]  ;;  %347 = vmatprep.mubr.msk.f32.mxu1 %vm389_vm0, %v390_v4  ;;  %v116_v8 = vld [vmem:[%s500_s3 + $0x8] sm:$0xff]  ;;  %13 = vst [vmem:[#allocation2] sm:$0x1] %v12_v32 }
   0x3   :  { %v117_v9 = vld [vmem:[%s500_s3 + $0x10] sm:$0xff]  ;;  %v118_v10 = vld [vmem:[%s500_s3 + $0x18] sm:$0xff]  ;;  %v365_v11 = vpack.c.bf16 %v32_v6, %v31_v3  ;;  %v368_v12 = vpack.c.bf16 %v116_v8, %v115_v7  ;;  %v119_v14 = vld [vmem:[%s500_s3 + $0x20] sm:$0xff] }
   0x4   :  { %363 = vmatpush3.bf16.msra.mxu0 %v362_v5  ;;  %v371_v13 = vpack.c.bf16 %v118_v10, %v117_v9  ;;  %v120_v15 = vld [vmem:[%s500_s3 + $0x28] sm:$0xff]  ;;  %v28_v16 = vld [vmem:[%s501_s0] sm:$0xff]  ;;  %v121_v18 = vld [vmem:[%s500_s3 + $0x30] sm:$0xff] }
   0x5   :  { %364 = vmatprep.subr.bf16.mxu0 %v388_v0  ;;  %369 = vmatpush3.bf16.msra.mxu1 %v368_v12  ;;  %v374_v17 = vpack.c.bf16 %v120_v15, %v119_v14  ;;  %v122_v19 = vld [vmem:[%s500_s3 + $0x38] sm:$0xff]  ;;  %v205_v21 = vld [vmem:[%s502_s5] sm:$0xff]  ;;  %v206_v22 = vld [vmem:[%s502_s5 + $0x8] sm:$0xff] }
   0x6   :  { %370 = vmatprep.subr.bf16.mxu1 %v388_v0  ;;  %v377_v20 = vpack.c.bf16 %v122_v19, %v121_v18  ;;  %v380_v23 = vpack.c.bf16 %v206_v22, %v205_v21  ;;  %v295_v24 = vld [vmem:[%s503_s2] ss:$0 sm:$0xff]  ;;  %v207_v29 = vld [vmem:[%s502_s5 + $0x10] sm:$0xff]  ;;  %v208_v30 = vld [vmem:[%s502_s5 + $0x18] sm:$0xff] }
   0x7   :  { %v383_v31 = vpack.c.bf16 %v208_v30, %v207_v29  ;;  %v297_v33 = vld [vmem:[%s505_s4] ss:$0 sm:$0xff] }
   0x8   :  { %366 = vmatpush3.bf16.msra.mxu0 %v365_v11 }
   0x9   :  { %379 = vmatprep.subr.bf16.mxu0 %v388_v0  ;;  %372 = vmatpush3.bf16.msra.mxu1 %v371_v13  ;;  %v299_v38 = vld [vmem:[#allocation2] ss:$0 sm:$0xff] }
   0xa   :  { %373 = vmatprep.subr.bf16.mxu1 %v388_v0 }
   0xb   :  { %329 = vmatmul.mubr.msk.f32.vlgmr.msra.gmra.mrb[0].mxu0 %vm40_vm1, %v28_v16 }
   0xc   :  { %358 = vmatprep.mubr.msk.f32.mxu0 %vm389_vm0, %v390_v4  ;;  %381 = vmatpush3.bf16.msra.mxu0 %v380_v23 }
   0xd   :  { %375 = vmatpush3.bf16.msra.mxu1 %v374_v17  ;;  %382 = vmatprep.subr.bf16.mxu0 %v388_v0 }
   0xe   :  { %376 = vmatprep.subr.bf16.mxu1 %v388_v0 }
  0x10   :  { %384 = vmatpush3.bf16.msra.mxu0 %v383_v31 }
  0x11   :  { %378 = vmatpush3.bf16.msra.mxu1 %v377_v20 }
  0xde   :  { %v110_v25 = vpop.f32.mrb[0].mxu0 }
  0xdf   :  { %v111_v26 = vadd.f32 %v295_v24, %v110_v25  ;;  %v330_v27 = vpop.f32.mrb[1].mxu0 }
  0xe1   :  { %v114_v28 = vmax.f32 %v111_v26, 0.0 }
  0xe3   :  { %348 = vmatmul.mubr.msk.f32.vlgmr.msra.gmra.mrb[0].mxu1 %vm130_vm2, %v114_v28 }
 0x1b6   :  { %v200_v34 = vpop.f32.mrb[0].mxu1 }
 0x1b7   :  { %v201_v35 = vadd.f32 %v297_v33, %v200_v34  ;;  %v349_v36 = vpop.f32.mrb[1].mxu1 }
 0x1b9   :  { %v204_v37 = vmax.f32 %v201_v35, 0.0 }
 0x1bb   :  { %359 = vmatmul.mubr.msk.f32.vlgmr.msra.gmra.mrb[2].mxu0 %vm40_vm1, %v204_v37 }
 0x28e   :  { %v285_v39 = vpop.f32.mrb[2].mxu0 }
 0x28f   :  { %v286_v40 = vadd.f32 %v299_v38, %v285_v39  ;;  %v360_v41 = vpop.f32.mrb[3].mxu0 }
 0x291   :  { %290 = vst.msk [vmem:[%s506_s7] sm:$0xff] %vm289_vm3, %v286_v40 }

// kernel: tpu_custom_call.1
= control target key start
LH: loop header
LB: loop body
LE: loop exit
PB: predicated region body
PF: predicated region fallthrough
CT: control target
= control target key end

     0   :  { %v388_v0 = vmov 0.0|0.0   ;;  %vm389_vm0 = vmmov 0   ;;  %v390_v4 = vmov 0.0   ;;  %vm40_vm1 = vcmask 261120   ;;  %s499_s1 = inlined_call_operand.vmem [shape: f32[32,64], index: 1, kind: input, shape index: {}]   ;;  %s500_s3 = inlined_call_operand.vmem [shape: f32[64,32], index: 3, kind: input, shape index: {}]   ;;  %s501_s0 = inlined_call_operand.vmem [shape: f32[8,32], index: 0, kind: input, shape index: {}]   ;;  %s502_s5 = inlined_call_operand.vmem [shape: f32[32,1], index: 5, kind: input, shape index: {}]   ;;  %s503_s2 = inlined_call_operand.vmem [shape: f32[1,64], index: 2, kind: input, shape index: {}]   ;;  %s504_s6 = inlined_call_operand.<no memory space> [shape: f32[1,1], index: 6, kind: input, shape index: {}]   ;;  %s505_s4 = inlined_call_operand.vmem [shape: f32[1,32], index: 4, kind: input, shape index: {}]   ;;  %s506_s7 = inlined_call_operand.vmem [shape: f32[8,1], index: 7, kind: output, shape index: {}]  }
   0x1   :  { %361 = vmatprep.subr.bf16.mxu0 %v388_v0  ;;  %v29_v1 = vld [vmem:[%s499_s1] sm:$0xff]  ;;  %v30_v2 = vld [vmem:[%s499_s1 + $0x8] sm:$0xff]  ;;  %v31_v3 = vld [vmem:[%s499_s1 + $0x10] sm:$0xff]  ;;  %328 = vmatprep.mubr.msk.f32.mxu0 %vm389_vm0, %v390_v4  ;;  %vm130_vm2 = vcmask 523264   ;;  %v12_v32 = vstv %s504_s6  ;;  %vm289_vm3 = vcmask 7168  }
   0x2   :  { %v362_v5 = vpack.c.bf16 %v30_v2, %v29_v1  ;;  %v32_v6 = vld [vmem:[%s499_s1 + $0x18] sm:$0xff]  ;;  %367 = vmatprep.subr.bf16.mxu1 %v388_v0  ;;  %v115_v7 = vld [vmem:[%s500_s3] sm:$0xff]  ;;  %347 = vmatprep.mubr.msk.f32.mxu1 %vm389_vm0, %v390_v4  ;;  %v116_v8 = vld [vmem:[%s500_s3 + $0x8] sm:$0xff]  ;;  %13 = vst [vmem:[#allocation2] sm:$0x1] %v12_v32 }
   0x3   :  { %v117_v9 = vld [vmem:[%s500_s3 + $0x10] sm:$0xff]  ;;  %v118_v10 = vld [vmem:[%s500_s3 + $0x18] sm:$0xff]  ;;  %v365_v11 = vpack.c.bf16 %v32_v6, %v31_v3  ;;  %v368_v12 = vpack.c.bf16 %v116_v8, %v115_v7  ;;  %v119_v14 = vld [vmem:[%s500_s3 + $0x20] sm:$0xff] }
   0x4   :  { %363 = vmatpush3.bf16.msra.mxu0 %v362_v5  ;;  %v371_v13 = vpack.c.bf16 %v118_v10, %v117_v9  ;;  %v120_v15 = vld [vmem:[%s500_s3 + $0x28] sm:$0xff]  ;;  %v28_v16 = vld [vmem:[%s501_s0] sm:$0xff]  ;;  %v121_v18 = vld [vmem:[%s500_s3 + $0x30] sm:$0xff] }
   0x5   :  { %364 = vmatprep.subr.bf16.mxu0 %v388_v0  ;;  %369 = vmatpush3.bf16.msra.mxu1 %v368_v12  ;;  %v374_v17 = vpack.c.bf16 %v120_v15, %v119_v14  ;;  %v122_v19 = vld [vmem:[%s500_s3 + $0x38] sm:$0xff]  ;;  %v205_v21 = vld [vmem:[%s502_s5] sm:$0xff]  ;;  %v206_v22 = vld [vmem:[%s502_s5 + $0x8] sm:$0xff] }
   0x6   :  { %370 = vmatprep.subr.bf16.mxu1 %v388_v0  ;;  %v377_v20 = vpack.c.bf16 %v122_v19, %v121_v18  ;;  %v380_v23 = vpack.c.bf16 %v206_v22, %v205_v21  ;;  %v295_v24 = vld [vmem:[%s503_s2] ss:$0 sm:$0xff]  ;;  %v207_v29 = vld [vmem:[%s502_s5 + $0x10] sm:$0xff]  ;;  %v208_v30 = vld [vmem:[%s502_s5 + $0x18] sm:$0xff] }
   0x7   :  { %v383_v31 = vpack.c.bf16 %v208_v30, %v207_v29  ;;  %v297_v33 = vld [vmem:[%s505_s4] ss:$0 sm:$0xff] }
   0x8   :  { %366 = vmatpush3.bf16.msra.mxu0 %v365_v11 }
   0x9   :  { %379 = vmatprep.subr.bf16.mxu0 %v388_v0  ;;  %372 = vmatpush3.bf16.msra.mxu1 %v371_v13  ;;  %v299_v38 = vld [vmem:[#allocation2] ss:$0 sm:$0xff] }
   0xa   :  { %373 = vmatprep.subr.bf16.mxu1 %v388_v0 }
   0xb   :  { %329 = vmatmul.mubr.msk.f32.vlgmr.msra.gmra.mrb[0].mxu0 %vm40_vm1, %v28_v16 }
   0xc   :  { %358 = vmatprep.mubr.msk.f32.mxu0 %vm389_vm0, %v390_v4  ;;  %381 = vmatpush3.bf16.msra.mxu0 %v380_v23 }
   0xd   :  { %375 = vmatpush3.bf16.msra.mxu1 %v374_v17  ;;  %382 = vmatprep.subr.bf16.mxu0 %v388_v0 }
   0xe   :  { %376 = vmatprep.subr.bf16.mxu1 %v388_v0 }
  0x10   :  { %384 = vmatpush3.bf16.msra.mxu0 %v383_v31 }
  0x11   :  { %378 = vmatpush3.bf16.msra.mxu1 %v377_v20 }
  0xde   :  { %v110_v25 = vpop.f32.mrb[0].mxu0 }
  0xdf   :  { %v111_v26 = vadd.f32 %v295_v24, %v110_v25  ;;  %v330_v27 = vpop.f32.mrb[1].mxu0 }
  0xe1   :  { %v114_v28 = vmax.f32 %v111_v26, 0.0 }
  0xe3   :  { %348 = vmatmul.mubr.msk.f32.vlgmr.msra.gmra.mrb[0].mxu1 %vm130_vm2, %v114_v28 }
 0x1b6   :  { %v200_v34 = vpop.f32.mrb[0].mxu1 }
 0x1b7   :  { %v201_v35 = vadd.f32 %v297_v33, %v200_v34  ;;  %v349_v36 = vpop.f32.mrb[1].mxu1 }
 0x1b9   :  { %v204_v37 = vmax.f32 %v201_v35, 0.0 }
 0x1bb   :  { %359 = vmatmul.mubr.msk.f32.vlgmr.msra.gmra.mrb[2].mxu0 %vm40_vm1, %v204_v37 }
 0x28e   :  { %v285_v39 = vpop.f32.mrb[2].mxu0 }
 0x28f   :  { %v286_v40 = vadd.f32 %v299_v38, %v285_v39  ;;  %v360_v41 = vpop.f32.mrb[3].mxu0 }
 0x291   :  { %290 = vst.msk [vmem:[%s506_s7] sm:$0xff] %vm289_vm3, %v286_v40 }

</bundles_post_ra>
